<compile_context>
chip_gen: v5e
topology: v5e:2x2
jax: 0.10.0
libtpu: 0.0.40
codegen_flags: <defaults>
</compile_context>

<pallas_src>
import functools

import numpy as np
import jax
import jax.numpy as jnp
from jax.experimental import pallas as pl
from jax.experimental.pallas import tpu as pltpu


def _vmem_capacity_bytes() -> int:
    """Physical VMEM of the attached TPU (fallback: v7x's 64 MiB, the smallest)."""
    try:
        return int(pltpu.get_tpu_info().vmem_capacity_bytes)
    except Exception:
        return 64 * 1024 * 1024


_VMEM_CAP = _vmem_capacity_bytes()


# ---------------------------------------------------------------------------
# 1-D resize matrices (host-side numpy constants).
# ---------------------------------------------------------------------------
def _linear_matrix(out_size: int, in_size: int, scale: float) -> np.ndarray:
    """Row-stochastic (out, in) linear-interp matrix, half-pixel centers
    (PyTorch align_corners=False semantics)."""
    o = np.arange(out_size, dtype=np.float64)
    src = np.clip((o + 0.5) / scale - 0.5, 0.0, in_size - 1)
    i0 = np.floor(src).astype(np.int64)
    i1 = np.minimum(i0 + 1, in_size - 1)
    w1 = src - i0
    w0 = 1.0 - w1
    m = np.zeros((out_size, in_size), dtype=np.float64)
    m[np.arange(out_size), i0] += w0
    m[np.arange(out_size), i1] += w1
    return m.astype(np.float32)


def _nearest_matrix(out_size: int, in_size: int, scale: float) -> np.ndarray:
    """One-hot (out, in) matrix for PyTorch default 'nearest' upsampling."""
    o = np.arange(out_size, dtype=np.float64)
    idx = np.clip(np.floor(o / scale).astype(np.int64), 0, in_size - 1)
    m = np.zeros((out_size, in_size), dtype=np.float32)
    m[np.arange(out_size), idx] = 1.0
    return m


# ---------------------------------------------------------------------------
# Kernel.
# ---------------------------------------------------------------------------
def _interp_kernel(x_ref, wwt_ref, whb_ref, o_ref):
    # x_ref:   (G, H_in,  W_in)   one channel-group block, straight NCHW layout
    # wwt_ref: (W_in, W_out)      W-axis interp matrix (transposed), resident
    # whb_ref: (G, H_out, H_in)   H-axis interp matrix broadcast over the group
    # o_ref:   (G, H_out, W_out)
    g, h_in, w_in = x_ref.shape
    w_out = wwt_ref.shape[-1]
    x = x_ref[...]

    if h_in % 8 == 0:
        # W-pass: fold the channel group into the matmul M dimension (free,
        # 8-aligned leading-dim merge -> no lane/sublane crossing) so MXU row
        # utilization grows with the block while the weight stays (W_in, W_out).
        tmp = jnp.dot(x.reshape(g * h_in, w_in), wwt_ref[...],
                      preferred_element_type=jnp.float32)
        tmp = tmp.reshape(g, h_in, w_out)
    else:
        # Fallback for unaligned H: batched matmul, no reshape across tiles.
        tmp = jnp.einsum("ghw,gwv->ghv", x,
                         jnp.broadcast_to(wwt_ref[...], (g, w_in, w_out)),
                         preferred_element_type=jnp.float32)

    # H-pass: batched matmul over the channel group (f32 accumulation).  For
    # bf16 inputs the W-pass accumulator is rounded back to bf16 here first —
    # a deliberate, documented precision trade.
    out = jnp.einsum("goh,ghw->gow", whb_ref[...], tmp.astype(whb_ref.dtype),
                     preferred_element_type=jnp.float32)
    o_ref[...] = out.astype(o_ref.dtype)


# ---------------------------------------------------------------------------
# Block-size heuristics (generation aware).
# ---------------------------------------------------------------------------
def _padded_vmem_bytes(g: int, rows: int, cols: int, itemsize: int) -> int:
    """VMEM footprint of a (g, rows, cols) block (last two dims tile to (8,128))."""
    return g * (-(-rows // 8) * 8) * (-(-cols // 128) * 128) * itemsize


def _pick_group(nc, h_in, w_in, h_out, w_out, itemsize):
    """Channels per grid step: target ~2 MiB of useful HBM bytes per step under a
    VMEM cap derived from the physical capacity."""
    per_ch_hbm = (h_in * w_in + h_out * w_out) * itemsize
    per_ch_vmem = (_padded_vmem_bytes(1, h_in, w_in, itemsize)       # in block
                   + _padded_vmem_bytes(1, h_out, w_out, itemsize)   # out block
                   + _padded_vmem_bytes(1, h_out, h_in, itemsize)    # whb share
                   + _padded_vmem_bytes(1, h_in, w_out, 4)           # f32 tmp
                   + _padded_vmem_bytes(1, h_out, w_out, 4))         # f32 out tmp
    target_hbm = 2 << 20
    g = max(1, min(nc, target_hbm // max(per_ch_hbm, 1)))
    budget = int(0.35 * _VMEM_CAP)               # for double-buffered blocks etc.
    g = max(1, min(g, budget // max(2 * per_ch_vmem, 1)))
    # Keep >=2 grid steps only when each step still moves >= ~1 MiB (v7x megacore
    # gets work; single-TC v5e/v6e never pay with a shrunken block).
    if nc * per_ch_hbm >= 2 * (1 << 20):
        g = min(g, -(-nc // 2))
    # Prefer a divisor of nc (avoids a padding copy of the input in HBM).
    if nc % g != 0:
        best = max(d for d in range(1, g + 1) if nc % d == 0)
        if 2 * best >= g:
            g = best
    return g


# ---------------------------------------------------------------------------
# Public wrapper (forward of the `Interpolate` module, NCHW input).
# ---------------------------------------------------------------------------
@functools.partial(jax.jit, static_argnames=("scale_factor", "mode"))
def interpolate(x: jnp.ndarray, scale_factor: int = 2, mode: str = "bilinear"):
    assert mode in ("bilinear", "nearest"), "only bilinear / nearest are implemented"
    n, c, h_in, w_in = x.shape
    h_out = int(h_in * scale_factor)
    w_out = int(w_in * scale_factor)
    nc = n * c
    itemsize = jnp.dtype(x.dtype).itemsize
    compute_dtype = jnp.bfloat16 if x.dtype == jnp.bfloat16 else jnp.float32

    make = _linear_matrix if mode == "bilinear" else _nearest_matrix
    wh = make(h_out, h_in, float(scale_factor))          # (H_out, H_in)
    wwt = make(w_out, w_in, float(scale_factor)).T       # (W_in,  W_out)

    g = _pick_group(nc, h_in, w_in, h_out, w_out, itemsize)
    nb = -(-nc // g)
    nc_pad = nb * g

    # NCHW -> (N*C, H, W) is a free view: no fold/unfold transposes.
    x_flat = x.reshape(nc, h_in, w_in)
    if nc_pad != nc:
        x_flat = jnp.pad(x_flat, ((0, nc_pad - nc), (0, 0), (0, 0)))

    wwt_c = jnp.asarray(wwt, dtype=compute_dtype)
    whb_c = jnp.broadcast_to(jnp.asarray(wh, dtype=compute_dtype)[None],
                             (g, h_out, h_in))

    # VMEM budget: double-buffered in/out blocks + resident weights + f32
    # intermediates, clamped below the physical capacity of this generation.
    w_item = jnp.dtype(compute_dtype).itemsize
    blk_in = _padded_vmem_bytes(g, h_in, w_in, itemsize)
    blk_out = _padded_vmem_bytes(g, h_out, w_out, itemsize)
    w_bytes = (_padded_vmem_bytes(1, w_in, w_out, w_item)
               + _padded_vmem_bytes(g, h_out, h_in, w_item))
    f32_tmps = (_padded_vmem_bytes(g, h_in, w_out, 4)
                + _padded_vmem_bytes(g, h_out, w_out, 4))
    requirement = 2 * (blk_in + blk_out) + 2 * w_bytes + f32_tmps
    vmem_limit = int(min(max(2 * requirement, 32 * 1024 * 1024),
                         int(0.8 * _VMEM_CAP)))
    vmem_limit = int(max(vmem_limit, requirement + (4 << 20)))

    out_flat = pl.pallas_call(
        _interp_kernel,
        out_shape=jax.ShapeDtypeStruct((nc_pad, h_out, w_out), x.dtype),
        grid_spec=pl.GridSpec(
            grid=(nb,),
            in_specs=[
                pl.BlockSpec((g, h_in, w_in), lambda i: (i, 0, 0)),
                pl.BlockSpec((w_in, w_out), lambda i: (0, 0)),
                pl.BlockSpec((g, h_out, h_in), lambda i: (0, 0, 0)),
            ],
            out_specs=pl.BlockSpec((g, h_out, w_out), lambda i: (i, 0, 0)),
        ),
        compiler_params=pltpu.CompilerParams(
            dimension_semantics=("parallel",),
            vmem_limit_bytes=vmem_limit,
        ),
    )(x_flat, wwt_c, whb_c)

    return out_flat[:nc].reshape(n, c, h_out, w_out)


# ---------------------------------------------------------------------------
# Reference (host-side, float64) and tests.
# ---------------------------------------------------------------------------
def _reference(x, scale_factor, mode):
    xn = np.asarray(x, dtype=np.float64)
    n, c, h_in, w_in = xn.shape
    h_out, w_out = h_in * scale_factor, w_in * scale_factor
    make = _linear_matrix if mode == "bilinear" else _nearest_matrix
    wh = make(h_out, h_in, float(scale_factor)).astype(np.float64)
    ww = make(w_out, w_in, float(scale_factor)).astype(np.float64)
    return np.einsum("oh,nchw,pw->ncop", wh, xn, ww, optimize=True)


def _max_err(a, b):
    return float(np.max(np.abs(np.asarray(a, dtype=np.float64) - np.asarray(b, dtype=np.float64))))


if __name__ == "__main__":
    key = jax.random.PRNGKey(0)
    k1, k2 = jax.random.split(key)

    # Small FPN-level feature map (NCHW).  Values are made bf16-representable so
    # the comparisons stay tight regardless of the MXU's f32 pass strategy.
    x = jax.random.normal(k1, (2, 4, 16, 16), jnp.float32)
    x = x.astype(jnp.bfloat16).astype(jnp.float32)

    # bilinear, align_corners=False (Interpolate / P1_upsample / P2_upsample).
    y = interpolate(x, scale_factor=2, mode="bilinear")
    jax.block_until_ready(y)
    assert y.shape == (2, 4, 32, 32), y.shape
    assert _max_err(y, _reference(x, 2, "bilinear")) < 1e-4

    # nearest (the bare F.interpolate(..., scale_factor=2) calls in FPN.forward).
    y_nn = interpolate(x, scale_factor=2, mode="nearest")
    jax.block_until_ready(y_nn)
    y_nn_ref = np.repeat(np.repeat(np.asarray(x), 2, axis=2), 2, axis=3)
    assert _max_err(y_nn, y_nn_ref) < 1e-4

    # Larger channel count: exercises the multi-step grid / channel-group batching.
    xl = jax.random.normal(k2, (2, 96, 32, 32), jnp.float32)
    xl = xl.astype(jnp.bfloat16).astype(jnp.float32)
    yl = interpolate(xl, scale_factor=2, mode="bilinear")
    jax.block_until_ready(yl)
    assert yl.shape == (2, 96, 64, 64), yl.shape
    assert _max_err(yl, _reference(xl, 2, "bilinear")) < 1e-4

    # bf16 path: bf16 operands on the MXU, f32 accumulation.
    xb = x.astype(jnp.bfloat16)
    yb = interpolate(xb, scale_factor=2, mode="bilinear")
    jax.block_until_ready(yb)
    assert yb.dtype == jnp.bfloat16 and yb.shape == (2, 4, 32, 32)
    assert _max_err(yb.astype(jnp.float32), _reference(x, 2, "bilinear")) < 5e-2

    print("KERNEL_OK")
</pallas_src>

<mosaic_0001>
module attributes {stable_mosaic.version = 11 : i64} {
  func.func @_interp_kernel(%arg0: i32, %arg1: memref<8x16x16xf32, #tpu.memory_space<vmem>>, %arg2: memref<16x32xf32, #tpu.memory_space<vmem>>, %arg3: memref<8x32x16xf32, #tpu.memory_space<vmem>>, %arg4: memref<8x32x32xf32, #tpu.memory_space<vmem>>) attributes {dimension_semantics = [#tpu.dimension_semantics<parallel>], iteration_bounds = array<i64: 1>, scalar_prefetch = 0 : i64, scratch_operands = 0 : i64, tpu.core_type = #tpu.core_type<tc>, window_params = [{transform_indices = @transform_0, window_bounds = array<i64: 8, 16, 16>}, {pipeline_mode = #tpu.pipeline_mode<synchronous>, transform_indices = @transform_1, window_bounds = array<i64: 16, 32>}, {pipeline_mode = #tpu.pipeline_mode<synchronous>, transform_indices = @transform_2, window_bounds = array<i64: 8, 32, 16>}, {transform_indices = @transform_3, window_bounds = array<i64: 8, 32, 32>}]} {
    %c0 = arith.constant 0 : index
    %c0_0 = arith.constant 0 : index
    %c0_1 = arith.constant 0 : index
    %0 = vector.load %arg1[%c0, %c0_0, %c0_1] : memref<8x16x16xf32, #tpu.memory_space<vmem>>, vector<8x16x16xf32>
    %1 = vector.shape_cast %0 : vector<8x16x16xf32> to vector<128x16xf32>
    %c0_2 = arith.constant 0 : index
    %c0_3 = arith.constant 0 : index
    %2 = vector.load %arg2[%c0_2, %c0_3] : memref<16x32xf32, #tpu.memory_space<vmem>>, vector<16x32xf32>
    %cst = arith.constant dense<0.000000e+00> : vector<128x32xf32>
    %3 = tpu.matmul %1, %2, %cst {dimension_numbers = #tpu.dot_dimension_numbers<[1], [0], [0], [1], [0, 0, 1, 1], [], []>} : vector<128x16xf32>, vector<16x32xf32>, vector<128x32xf32> -> vector<128x32xf32>
    %4 = vector.shape_cast %3 : vector<128x32xf32> to vector<8x16x32xf32>
    %c0_4 = arith.constant 0 : index
    %c0_5 = arith.constant 0 : index
    %c0_6 = arith.constant 0 : index
    %5 = vector.load %arg3[%c0_4, %c0_5, %c0_6] : memref<8x32x16xf32, #tpu.memory_space<vmem>>, vector<8x32x16xf32>
    "tpu.trace_start"() <{level = 10 : i32, message = "goh,ghw->gow"}> : () -> ()
    %cst_7 = arith.constant dense<0.000000e+00> : vector<8x32x32xf32>
    %6 = tpu.matmul %5, %4, %cst_7 {dimension_numbers = #tpu.dot_dimension_numbers<[2], [1], [1], [2], [0, 0, 0, 1, 1, 2], [0], [0]>} : vector<8x32x16xf32>, vector<8x16x32xf32>, vector<8x32x32xf32> -> vector<8x32x32xf32>
    "tpu.trace_stop"() : () -> ()
    %c0_8 = arith.constant 0 : index
    %c0_9 = arith.constant 0 : index
    %c0_10 = arith.constant 0 : index
    %7 = vector.load %arg4[%c0_8, %c0_9, %c0_10] : memref<8x32x32xf32, #tpu.memory_space<vmem>>, vector<8x32x32xf32>
    tpu.vector_store %arg4[%c0_8, %c0_9, %c0_10], %6 {strides = array<i32>} : memref<8x32x32xf32, #tpu.memory_space<vmem>>, vector<8x32x32xf32>,
    return
  }
  func.func @transform_0(%arg0: i32) -> (i32, i32, i32) {
    %c0_i32 = arith.constant 0 : i32
    %c0_i32_0 = arith.constant 0 : i32
    %c0_i32_1 = arith.constant 0 : i32
    return %arg0, %c0_i32, %c0_i32_0 : i32, i32, i32
  }
  func.func @transform_1(%arg0: i32) -> (i32, i32) {
    %c0_i32 = arith.constant 0 : i32
    %c0_i32_0 = arith.constant 0 : i32
    %c0_i32_1 = arith.constant 0 : i32
    return %c0_i32, %c0_i32_0 : i32, i32
  }
  func.func @transform_2(%arg0: i32) -> (i32, i32, i32) {
    %c0_i32 = arith.constant 0 : i32
    %c0_i32_0 = arith.constant 0 : i32
    %c0_i32_1 = arith.constant 0 : i32
    %c0_i32_2 = arith.constant 0 : i32
    return %c0_i32, %c0_i32_0, %c0_i32_1 : i32, i32, i32
  }
  func.func @transform_3(%arg0: i32) -> (i32, i32, i32) {
    %c0_i32 = arith.constant 0 : i32
    %c0_i32_0 = arith.constant 0 : i32
    %c0_i32_1 = arith.constant 0 : i32
    return %arg0, %c0_i32, %c0_i32_0 : i32, i32, i32
  }
}

</mosaic_0001>

<bundles_post_ra>
// kernel: interpolate.1
= control target key start
LH: loop header
LB: loop body
LE: loop exit
PB: predicated region body
PF: predicated region fallthrough
CT: control target
= control target key end

     0   :  { %vm33_vm0 = vcmask 130048   ;;  %s893_s0 = inlined_call_operand.vmem [shape: f32[8,16,16], index: 0, kind: input, shape index: {}]   ;;  %s894_s1 = inlined_call_operand.vmem [shape: f32[16,32], index: 1, kind: input, shape index: {}]   ;;  %s895_s2 = inlined_call_operand.vmem [shape: f32[8,32,16], index: 2, kind: input, shape index: {}]   ;;  %s896_s3 = inlined_call_operand.hbm [shape: f32[8,32,32], index: 3, kind: output, shape index: {}]  }
   0x1   :  { %v32_v0 = vld [vmem:[%s894_s1 + $0x8] sm:$0xff]  ;;  %v31_v1 = vld [vmem:[%s894_s1] sm:$0xff] }
   0x2   :  { %96 = vmatpush.msra.mxu0 %v32_v0  ;;  %v15_v2 = vld [vmem:[%s893_s0] sm:$0xff]  ;;  %606 = vmatpush.msra.mxu3 %v32_v0 }
   0x3   :  { %8 = vsyncpa [#allocation3], 0  ;;  %v16_v3 = vld [vmem:[%s893_s0 + $0x8] sm:$0xff]  ;;  %v17_v4 = vld [vmem:[%s893_s0 + $0x10] sm:$0xff]  ;;  %vm507_vm1 = vcmask 261120   ;;  %s546_s27 = sshll.u32 %s896_s3, 4  ;;  %s547_s27 = int_to_ptr.hbm [resolvable:$true] %s546_s27 }
   0x4   :  { %97 = vmatpush.msra.mxu0 %v31_v1  ;;  %607 = vmatpush.msra.mxu3 %v31_v1  ;;  %v18_v5 = vld [vmem:[%s893_s0 + $0x18] sm:$0xff]  ;;  %v19_v6 = vld [vmem:[%s893_s0 + $0x20] sm:$0xff]  ;;  %v20_v8 = vld [vmem:[%s893_s0 + $0x28] sm:$0xff]  ;;  %s638_s28 = smov 128   ;;  %s639_s29 = smov 8  }
   0x5   :  { %558 = vmatmul.msk.f32.vlgmr.msra.gmra.mxu0 %vm33_vm0, %v15_v2  ;;  %v27_v7 = vld [vmem:[%s893_s0 + $0x60] sm:$0xff]  ;;  %v28_v9 = vld [vmem:[%s893_s0 + $0x68] sm:$0xff]  ;;  %v21_v10 = vld [vmem:[%s893_s0 + $0x30] sm:$0xff] }
   0x6   :  { %570 = vmatmul.msk.f32.vlgmr.msra.gmra.mxu3 %vm33_vm0, %v27_v7  ;;  %v29_v11 = vld [vmem:[%s893_s0 + $0x70] sm:$0xff]  ;;  %v22_v12 = vld [vmem:[%s893_s0 + $0x38] sm:$0xff]  ;;  %v23_v14 = vld [vmem:[%s893_s0 + $0x40] sm:$0xff] }
   0x7   :  { %v30_v13 = vld [vmem:[%s893_s0 + $0x78] sm:$0xff]  ;;  %v24_v15 = vld [vmem:[%s893_s0 + $0x48] sm:$0xff]  ;;  %v25_v16 = vld [vmem:[%s893_s0 + $0x50] sm:$0xff] }
   0x8   :  { %v26_v17 = vld [vmem:[%s893_s0 + $0x58] sm:$0xff]  ;;  %v147_v21 = vld [vmem:[%s895_s2] sm:$0xff]  ;;  %v148_v24 = vld [vmem:[%s895_s2 + $0x8] sm:$0xff] }
   0x9   :  { %v151_v23 = vld [vmem:[%s895_s2 + $0x20] sm:$0xff]  ;;  %v152_v26 = vld [vmem:[%s895_s2 + $0x28] sm:$0xff]  ;;  %v149_v27 = vld [vmem:[%s895_s2 + $0x10] sm:$0xff] }
   0xa   :  { %v153_v29 = vld [vmem:[%s895_s2 + $0x30] sm:$0xff]  ;;  %v150_v30 = vld [vmem:[%s895_s2 + $0x18] sm:$0xff]  ;;  %v155_v32 = vld [vmem:[%s895_s2 + $0x40] sm:$0xff] }
   0xb   :  { %v154_v34 = vld [vmem:[%s895_s2 + $0x38] sm:$0xff]  ;;  %v156_v35 = vld [vmem:[%s895_s2 + $0x48] sm:$0xff]  ;;  %v159_v38 = vld [vmem:[%s895_s2 + $0x60] sm:$0xff] }
   0xc   :  { %v157_v39 = vld [vmem:[%s895_s2 + $0x50] sm:$0xff]  ;;  %v160_v42 = vld [vmem:[%s895_s2 + $0x68] sm:$0xff]  ;;  %v158_v43 = vld [vmem:[%s895_s2 + $0x58] sm:$0xff] }
   0xd   :  { %559 = vmatmul.msk.f32.gmra.mxu0 %vm33_vm0, %v16_v3  ;;  %v163_v46 = vld [vmem:[%s895_s2 + $0x80] sm:$0xff]  ;;  %v161_v47 = vld [vmem:[%s895_s2 + $0x70] sm:$0xff]  ;;  %v164_v49 = vld [vmem:[%s895_s2 + $0x88] sm:$0xff] }
   0xe   :  { %571 = vmatmul.msk.f32.gmra.mxu3 %vm33_vm0, %v28_v9  ;;  %v162_v50 = vld [vmem:[%s895_s2 + $0x78] sm:$0xff]  ;;  %v167_v52 = vld [vmem:[%s895_s2 + $0xa0] sm:$0xff]  ;;  %v165_v53 = vld [vmem:[%s895_s2 + $0x90] sm:$0xff] }
   0xf   :  { %v171_v54 = vld [vmem:[%s895_s2 + $0xc0] sm:$0xff]  ;;  %v168_v55 = vld [vmem:[%s895_s2 + $0xa8] sm:$0xff]  ;;  %v166_v56 = vld [vmem:[%s895_s2 + $0x98] sm:$0xff] }
  0x10   :  { %v172_v57 = vld [vmem:[%s895_s2 + $0xc8] sm:$0xff]  ;;  %v169_v58 = vld [vmem:[%s895_s2 + $0xb0] sm:$0xff]  ;;  %v175_v59 = vld [vmem:[%s895_s2 + $0xe0] sm:$0xff] }
  0x11   :  { %v173_v60 = vld [vmem:[%s895_s2 + $0xd0] sm:$0xff]  ;;  %v170_v61 = vld [vmem:[%s895_s2 + $0xb8] sm:$0xff]  ;;  %v176_v62 = vld [vmem:[%s895_s2 + $0xe8] sm:$0xff] }
  0x12   :  { %v174_v63 = vld [vmem:[%s895_s2 + $0xd8] sm:$0xff]  ;;  %v177_v0 = vld [vmem:[%s895_s2 + $0xf0] sm:$0xff] }
  0x13   :  { %v178_v1 = vld [vmem:[%s895_s2 + $0xf8] sm:$0xff]  ;;  %s637_s2 = smov [#allocation2]  }
  0x14   :  { %s544_s24 = sshll.u32 %s637_s2, 4  ;;  %s545_s24 = int_to_ptr.vmem [resolvable:$true] %s544_s24 }
  0x15   :  { %560 = vmatmul.msk.f32.gmra.mxu0 %vm33_vm0, %v17_v4 }
  0x16   :  { %572 = vmatmul.msk.f32.gmra.mxu3 %vm33_vm0, %v29_v11 }
  0x1d   :  { %561 = vmatmul.msk.f32.gmra.mxu0 %vm33_vm0, %v18_v5 }
  0x1e   :  { %573 = vmatmul.msk.f32.gmra.mxu3 %vm33_vm0, %v30_v13 }
  0x25   :  { %562 = vmatmul.msk.f32.gmra.mxu0 %vm33_vm0, %v19_v6 }
  0x2d   :  { %563 = vmatmul.msk.f32.gmra.mxu0 %vm33_vm0, %v20_v8 }
  0x35   :  { %564 = vmatmul.msk.f32.gmra.mxu0 %vm33_vm0, %v21_v10 }
  0x3d   :  { %565 = vmatmul.msk.f32.gmra.mxu0 %vm33_vm0, %v22_v12 }
  0x45   :  { %566 = vmatmul.msk.f32.gmra.mxu0 %vm33_vm0, %v23_v14 }
  0x4d   :  { %567 = vmatmul.msk.f32.gmra.mxu0 %vm33_vm0, %v24_v15 }
  0x55   :  { %568 = vmatmul.msk.f32.gmra.mxu0 %vm33_vm0, %v25_v16 }
  0x5d   :  { %569 = vmatmul.msk.f32.gmra.mxu0 %vm33_vm0, %v26_v17 }
  0x82   :  { %v99_v18 = vpop.f32.mrf.mxu0 }
  0x89   :  { %v135_v31 = vpop.f32.mrf.mxu3 }
  0x8a   :  { %v102_v19 = vpop.f32.mrf.mxu0 }
  0x8b   :  { %205 = vmatpush.msra.mxu1 %v102_v19 }
  0x8d   :  { %206 = vmatpush.msra.mxu1 %v99_v18 }
  0x8e   :  { %574 = vmatmul.msk.f32.vlgmr.msra.gmra.mxu1 %vm33_vm0, %v147_v21 }
  0x91   :  { %v138_v36 = vpop.f32.mrf.mxu3 }
  0x92   :  { %v105_v20 = vpop.f32.mrf.mxu0 }
  0x96   :  { %575 = vmatmul.msk.f32.gmra.mxu1 %vm33_vm0, %v148_v24 }
  0x99   :  { %v141_v40 = vpop.f32.mrf.mxu3 }
  0x9a   :  { %v108_v22 = vpop.f32.mrf.mxu0 }
  0x9b   :  { %246 = vmatpush.msra.mxu2 %v108_v22 }
  0x9d   :  { %247 = vmatpush.msra.mxu2 %v105_v20 }
  0x9e   :  { %578 = vmatmul.msk.f32.vlgmr.msra.gmra.mxu2 %vm33_vm0, %v151_v23  ;;  %576 = vmatmul.msk.f32.gmra.mxu1 %vm33_vm0, %v149_v27 }
  0xa1   :  { %v144_v45 = vpop.f32.mrf.mxu3 }
  0xa2   :  { %v111_v25 = vpop.f32.mrf.mxu0 }
  0xa6   :  { %579 = vmatmul.msk.f32.gmra.mxu2 %vm33_vm0, %v152_v26  ;;  %577 = vmatmul.msk.f32.gmra.mxu1 %vm33_vm0, %v150_v30 }
  0xaa   :  { %v114_v28 = vpop.f32.mrf.mxu0 }
  0xab   :  { %287 = vmatpush.msrb.mxu3 %v114_v28 }
  0xad   :  { %288 = vmatpush.msrb.mxu3 %v111_v25 }
  0xae   :  { %580 = vmatmul.msk.f32.gmra.mxu2 %vm33_vm0, %v153_v29  ;;  %582 = vmatmul.msk.f32.vlgmr.msrb.gmra.mxu3 %vm33_vm0, %v155_v32 }
  0xb2   :  { %v117_v33 = vpop.f32.mrf.mxu0 }
  0xb6   :  { %581 = vmatmul.msk.f32.gmra.mxu2 %vm33_vm0, %v154_v34  ;;  %583 = vmatmul.msk.f32.gmra.mxu3 %vm33_vm0, %v156_v35 }
  0xba   :  { %v120_v37 = vpop.f32.mrf.mxu0 }
  0xbb   :  { %328 = vmatpush.msrb.mxu1 %v120_v37 }
  0xbd   :  { %329 = vmatpush.msrb.mxu1 %v117_v33 }
  0xbe   :  { %586 = vmatmul.msk.f32.vlgmr.msrb.gmra.mxu1 %vm33_vm0, %v159_v38  ;;  %584 = vmatmul.msk.f32.gmra.mxu3 %vm33_vm0, %v157_v39 }
  0xbf   :  { %451 = vmatpush.msra.mxu1 %v138_v36 }
  0xc1   :  { %452 = vmatpush.msra.mxu1 %v135_v31 }
  0xc2   :  { %v123_v41 = vpop.f32.mrf.mxu0 }
  0xc6   :  { %587 = vmatmul.msk.f32.gmra.mxu1 %vm33_vm0, %v160_v42  ;;  %585 = vmatmul.msk.f32.gmra.mxu3 %vm33_vm0, %v158_v43 }
  0xca   :  { %v126_v44 = vpop.f32.mrf.mxu0 }
  0xcb   :  { %369 = vmatpush.msrb.mxu2 %v126_v44 }
  0xcd   :  { %370 = vmatpush.msrb.mxu2 %v123_v41 }
  0xce   :  { %590 = vmatmul.msk.f32.vlgmr.msrb.gmra.mxu2 %vm33_vm0, %v163_v46  ;;  %588 = vmatmul.msk.f32.gmra.mxu1 %vm33_vm0, %v161_v47 }
  0xcf   :  { %492 = vmatpush.msra.mxu2 %v144_v45 }
  0xd1   :  { %493 = vmatpush.msra.mxu2 %v141_v40 }
  0xd2   :  { %v129_v48 = vpop.f32.mrf.mxu0 }
  0xd6   :  { %591 = vmatmul.msk.f32.gmra.mxu2 %vm33_vm0, %v164_v49  ;;  %589 = vmatmul.msk.f32.gmra.mxu1 %vm33_vm0, %v162_v50 }
  0xda   :  { %v132_v51 = vpop.f32.mrf.mxu0 }
  0xdb   :  { %410 = vmatpush.msra.mxu3 %v132_v51 }
  0xdd   :  { %411 = vmatpush.msra.mxu3 %v129_v48 }
  0xde   :  { %594 = vmatmul.msk.f32.vlgmr.msra.gmra.mxu3 %vm33_vm0, %v167_v52  ;;  %592 = vmatmul.msk.f32.gmra.mxu2 %vm33_vm0, %v165_v53 }
  0xdf   :  { %598 = vmatmul.msk.f32.vlgmr.msra.gmra.mxu1 %vm33_vm0, %v171_v54 }
  0xe6   :  { %595 = vmatmul.msk.f32.gmra.mxu3 %vm33_vm0, %v168_v55  ;;  %593 = vmatmul.msk.f32.gmra.mxu2 %vm33_vm0, %v166_v56 }
  0xe7   :  { %599 = vmatmul.msk.f32.gmra.mxu1 %vm33_vm0, %v172_v57 }
  0xee   :  { %596 = vmatmul.msk.f32.gmra.mxu3 %vm33_vm0, %v169_v58  ;;  %602 = vmatmul.msk.f32.vlgmr.msra.gmra.mxu2 %vm33_vm0, %v175_v59 }
  0xef   :  { %600 = vmatmul.msk.f32.gmra.mxu1 %vm33_vm0, %v173_v60 }
  0xf6   :  { %597 = vmatmul.msk.f32.gmra.mxu3 %vm33_vm0, %v170_v61  ;;  %603 = vmatmul.msk.f32.gmra.mxu2 %vm33_vm0, %v176_v62 }
  0xf7   :  { %601 = vmatmul.msk.f32.gmra.mxu1 %vm33_vm0, %v174_v63 }
  0xfe   :  { %604 = vmatmul.msk.f32.gmra.mxu2 %vm33_vm0, %v177_v0 }
 0x106   :  { %605 = vmatmul.msk.f32.gmra.mxu2 %vm33_vm0, %v178_v1 }
 0x10b   :  { %v208_v2 = vpop.f32.mrf.mxu1 }
 0x10c   :  { %508 = vst.msk [vmem:[#allocation2] sm:$0xff] %vm507_vm1, %v208_v2 }
 0x113   :  { %v211_v3 = vpop.f32.mrf.mxu1 }
 0x114   :  { %509 = vst.msk [vmem:[#allocation2 + $0x8] sm:$0xff] %vm507_vm1, %v211_v3 }
 0x11b   :  { %v214_v5 = vpop.f32.mrf.mxu1 }
 0x11c   :  { %510 = vst.msk [vmem:[#allocation2 + $0x10] sm:$0xff] %vm507_vm1, %v214_v5 }
 0x121   :  { %v249_v4 = vpop.f32.mrf.mxu2 }
 0x122   :  { %512 = vst.msk [vmem:[#allocation2 + $0x20] sm:$0xff] %vm507_vm1, %v249_v4 }
 0x123   :  { %v217_v7 = vpop.f32.mrf.mxu1 }
 0x124   :  { %511 = vst.msk [vmem:[#allocation2 + $0x18] sm:$0xff] %vm507_vm1, %v217_v7 }
 0x129   :  { %v252_v6 = vpop.f32.mrf.mxu2 }
 0x12a   :  { %513 = vst.msk [vmem:[#allocation2 + $0x28] sm:$0xff] %vm507_vm1, %v252_v6 }
 0x131   :  { %v255_v8 = vpop.f32.mrf.mxu2  ;;  %v290_v9 = vpop.f32.mrf.mxu3 }
 0x132   :  { %514 = vst.msk [vmem:[#allocation2 + $0x30] sm:$0xff] %vm507_vm1, %v255_v8 }
 0x133   :  { %516 = vst.msk [vmem:[#allocation2 + $0x40] sm:$0xff] %vm507_vm1, %v290_v9 }
 0x139   :  { %v258_v10 = vpop.f32.mrf.mxu2  ;;  %v293_v11 = vpop.f32.mrf.mxu3 }
 0x13a   :  { %515 = vst.msk [vmem:[#allocation2 + $0x38] sm:$0xff] %vm507_vm1, %v258_v10 }
 0x13b   :  { %517 = vst.msk [vmem:[#allocation2 + $0x48] sm:$0xff] %vm507_vm1, %v293_v11  ;;  %v331_v12 = vpop.f32.mrf.mxu1 }
 0x13c   :  { %520 = vst.msk [vmem:[#allocation2 + $0x60] sm:$0xff] %vm507_vm1, %v331_v12 }
 0x141   :  { %v296_v13 = vpop.f32.mrf.mxu3 }
 0x142   :  { %518 = vst.msk [vmem:[#allocation2 + $0x50] sm:$0xff] %vm507_vm1, %v296_v13 }
 0x143   :  { %v334_v14 = vpop.f32.mrf.mxu1 }
 0x144   :  { %521 = vst.msk [vmem:[#allocation2 + $0x68] sm:$0xff] %vm507_vm1, %v334_v14 }
 0x149   :  { %v299_v15 = vpop.f32.mrf.mxu3 }
 0x14a   :  { %519 = vst.msk [vmem:[#allocation2 + $0x58] sm:$0xff] %vm507_vm1, %v299_v15 }
 0x14b   :  { %v337_v16 = vpop.f32.mrf.mxu1 }
 0x14c   :  { %522 = vst.msk [vmem:[#allocation2 + $0x70] sm:$0xff] %vm507_vm1, %v337_v16 }
 0x151   :  { %v372_v17 = vpop.f32.mrf.mxu2 }
 0x152   :  { %524 = vst.msk [vmem:[#allocation2 + $0x80] sm:$0xff] %vm507_vm1, %v372_v17 }
 0x153   :  { %v340_v18 = vpop.f32.mrf.mxu1 }
 0x154   :  { %523 = vst.msk [vmem:[#allocation2 + $0x78] sm:$0xff] %vm507_vm1, %v340_v18 }
 0x159   :  { %v375_v19 = vpop.f32.mrf.mxu2 }
 0x15a   :  { %525 = vst.msk [vmem:[#allocation2 + $0x88] sm:$0xff] %vm507_vm1, %v375_v19 }
 0x15c   :  { %v454_v20 = vpop.f32.mrf.mxu1 }
 0x15d   :  { %532 = vst.msk [vmem:[#allocation2 + $0xc0] sm:$0xff] %vm507_vm1, %v454_v20 }
 0x161   :  { %v413_v21 = vpop.f32.mrf.mxu3  ;;  %v378_v22 = vpop.f32.mrf.mxu2 }
 0x162   :  { %528 = vst.msk [vmem:[#allocation2 + $0xa0] sm:$0xff] %vm507_vm1, %v413_v21 }
 0x163   :  { %526 = vst.msk [vmem:[#allocation2 + $0x90] sm:$0xff] %vm507_vm1, %v378_v22 }
 0x164   :  { %v457_v23 = vpop.f32.mrf.mxu1 }
 0x165   :  { %533 = vst.msk [vmem:[#allocation2 + $0xc8] sm:$0xff] %vm507_vm1, %v457_v23 }
 0x169   :  { %v416_v24 = vpop.f32.mrf.mxu3  ;;  %v381_v25 = vpop.f32.mrf.mxu2 }
 0x16a   :  { %529 = vst.msk [vmem:[#allocation2 + $0xa8] sm:$0xff] %vm507_vm1, %v416_v24 }
 0x16b   :  { %527 = vst.msk [vmem:[#allocation2 + $0x98] sm:$0xff] %vm507_vm1, %v381_v25 }
 0x16c   :  { %v460_v26 = vpop.f32.mrf.mxu1 }
 0x16d   :  { %534 = vst.msk [vmem:[#allocation2 + $0xd0] sm:$0xff] %vm507_vm1, %v460_v26 }
 0x171   :  { %v419_v27 = vpop.f32.mrf.mxu3  ;;  %v495_v28 = vpop.f32.mrf.mxu2 }
 0x172   :  { %530 = vst.msk [vmem:[#allocation2 + $0xb0] sm:$0xff] %vm507_vm1, %v419_v27 }
 0x173   :  { %536 = vst.msk [vmem:[#allocation2 + $0xe0] sm:$0xff] %vm507_vm1, %v495_v28 }
 0x174   :  { %v463_v29 = vpop.f32.mrf.mxu1 }
 0x175   :  { %535 = vst.msk [vmem:[#allocation2 + $0xd8] sm:$0xff] %vm507_vm1, %v463_v29 }
 0x179   :  { %v422_v30 = vpop.f32.mrf.mxu3  ;;  %v498_v31 = vpop.f32.mrf.mxu2 }
 0x17a   :  { %531 = vst.msk [vmem:[#allocation2 + $0xb8] sm:$0xff] %vm507_vm1, %v422_v30 }
 0x17b   :  { %537 = vst.msk [vmem:[#allocation2 + $0xe8] sm:$0xff] %vm507_vm1, %v498_v31 }
 0x181   :  { %v501_v32 = vpop.f32.mrf.mxu2 }
 0x182   :  { %538 = vst.msk [vmem:[#allocation2 + $0xf0] sm:$0xff] %vm507_vm1, %v501_v32 }
 0x189   :  { %v504_v33 = vpop.f32.mrf.mxu2 }
 0x18a   :  { %539 = vst.msk [vmem:[#allocation2 + $0xf8] sm:$0xff] %vm507_vm1, %v504_v33 }
 0x18b   :  { %552 = dma.vmem_to_hbm [thread:$0]  %s545_s24, 4096, %s547_s27, [#allocation3], %s638_s28, %s638_s28, %s639_s29  }
 0x18c   :  { %635 = dma.done.wait [#allocation3], 4096  }
 0x18d   :  { %636 = vsyncadd [#allocation3], 4294963200 }
 0x18e   :  { %557 = vsyncpa [#allocation3], 1 }

</bundles_post_ra>
